<compile_context>
chip_gen: v7x
topology: tpu7x:2x2x1
jax: 0.10.0
libtpu: 0.0.40
codegen_flags: <defaults>
</compile_context>

<pallas_src>
import functools

import jax
import jax.numpy as jnp
from jax.experimental import pallas as pl
from jax.experimental.pallas import tpu as pltpu

FOLD = 16  # batch rows folded per lane-dense row: FOLD * action_dim(8) = 128 lanes


def _mlp_agent_kernel(x_ref, w1_ref, w2c_ref, w3c_ref, w4_ref, b_ref, out_ref,
                      *, max_action, return_logits):
    # x_ref : (tbf, fold*obs) f32              (tbf = batch_tile / fold)
    # w1_ref: bf16, either (fold*obs, fold*hid) block-diag or a single
    #         ((fold/NC)*obs, C) diagonal super-block reused for all chunks
    # w2c_ref, w3c_ref: (C, C) bf16 diagonal super-block, C = (fold/NC)*hid
    # w4_ref: (fold*hid, fold*act) bf16 block-diag
    # b_ref : (4, fold*max(hid, act)) f32 fold-tiled packed biases
    out_w = out_ref.shape[-1]              # fold * act (= 128 lanes)
    hid_w = w4_ref.shape[0]                # fold * hid
    C = w2c_ref.shape[0]                   # diagonal super-block width
    n_chunks = hid_w // C
    w1_chunked = (w1_ref.shape[1] == C) and n_chunks > 1

    x = x_ref[...].astype(jnp.bfloat16)    # free VPU cast under the MXU

    # fc1 + ReLU (chunked when the obs chunk width is lane aligned)
    if w1_chunked:
        obs_c = w1_ref.shape[0]
        b1 = b_ref[0:1, :C]
        hs = [jnp.dot(x[:, j * obs_c:(j + 1) * obs_c], w1_ref[...],
                      preferred_element_type=jnp.float32) + b1
              for j in range(n_chunks)]
    else:
        h = jnp.dot(x, w1_ref[...], preferred_element_type=jnp.float32)
        h = h + b_ref[0:1, :hid_w]
        hs = [h[:, j * C:(j + 1) * C] for j in range(n_chunks)]
    hs = [jnp.maximum(hj, 0.0) for hj in hs]

    # fc2 / fc3 + ReLU: one (C, C) dot per diagonal super-block; every
    # super-block shares the same weight, so a single resident copy is reused.
    b2 = b_ref[1:2, :C]
    hs = [jnp.maximum(jnp.dot(hj.astype(jnp.bfloat16), w2c_ref[...],
                              preferred_element_type=jnp.float32) + b2, 0.0)
          for hj in hs]
    b3 = b_ref[2:3, :C]
    hs = [jnp.maximum(jnp.dot(hj.astype(jnp.bfloat16), w3c_ref[...],
                              preferred_element_type=jnp.float32) + b3, 0.0)
          for hj in hs]
    h = hs[0] if n_chunks == 1 else jnp.concatenate(hs, axis=-1)

    # action_out (folded block-diag) + max_action*tanh epilogue
    a = jnp.dot(h.astype(jnp.bfloat16), w4_ref[...],
                preferred_element_type=jnp.float32) + b_ref[3:4, :out_w]
    if not return_logits:
        a = max_action * jnp.tanh(a)       # f32 epilogue (EUP)
    out_ref[...] = a.astype(out_ref.dtype)  # full 128-lane unmasked store


def _is_v5e():
    try:
        kind = jax.devices()[0].device_kind.lower()
    except Exception:
        return False
    return ("v5 lite" in kind) or ("v5e" in kind) or ("v5litepod" in kind)


def fold_params(params, fold=FOLD, n_chunks=None):
    """Build fold-way block-diagonal bf16 weights + one packed f32 bias array.

    fc2/fc3 (and fc1 when lane-aligned) are emitted as a SINGLE diagonal
    super-block kron(eye(fold // n_chunks), W): all super-blocks along the
    diagonal are identical, so one resident copy serves every chunk dot.
    """
    (w1, b1), (w2, b2), (w3, b3), (w4, b4) = (
        params[n] for n in ("fc1", "fc2", "fc3", "action_out"))
    obs, hid = w1.shape
    act = w4.shape[1]

    if n_chunks is None:
        # Match the super-block width to the MXU: 128 on v5e, 256 on v6e/v7x.
        target = 128 if _is_v5e() else 256
        n_chunks = max(1, (fold * hid) // target)
    # Chunks must evenly split the fold and stay 128-lane aligned.
    while n_chunks > 1 and (fold % n_chunks or ((fold // n_chunks) * hid) % 128):
        n_chunks -= 1
    fpc = fold // n_chunks

    def blockdiag(w, k):
        return jnp.kron(jnp.eye(k, dtype=jnp.float32), w).astype(jnp.bfloat16)

    w1_chunked = n_chunks > 1 and (fpc * obs) % 128 == 0
    w1f = blockdiag(w1, fpc if w1_chunked else fold)
    w2c = blockdiag(w2, fpc)
    w3c = blockdiag(w3, fpc)
    w4f = blockdiag(w4, fold)

    width = fold * max(hid, act)   # bias rows fit even if action_dim > hidden_dim

    def tile_pad(b):
        t = jnp.tile(jnp.asarray(b, jnp.float32).reshape(1, -1), (1, fold))
        return jnp.pad(t, ((0, 0), (0, width - t.shape[1])))

    bpack = jnp.concatenate(
        [tile_pad(b1), tile_pad(b2), tile_pad(b3), tile_pad(b4)], axis=0)

    return {"w1": w1f, "w2c": w2c, "w3c": w3c, "w4": w4f, "bpack": bpack,
            "fold": fold}


def mlp_agent_forward(inputs, folded, *, max_action, hidden_state=None,
                      return_logits=False, block_rows=8192):
    """inputs: [B, obs_dim] f32.  folded: output of fold_params()."""
    w1, w2c, w3c, w4, bpack = (folded["w1"], folded["w2c"], folded["w3c"],
                               folded["w4"], folded["bpack"])
    fold = folded["fold"]
    B, obs = inputs.shape
    act = w4.shape[1] // fold

    # Batch tile: tbf (= tb/fold) must be a multiple of 8 for (8,128)-aligned
    # blocks, so tiles come in units of `step` = 8*fold rows.  Cap 16384 rows
    # (VMEM byte math in the header comment, safe on v7x's 64 MiB VMEM / 32 MiB
    # scoped default); keep the grid >= 2 steps when the batch allows it so
    # v7x megacore sharding and DMA/compute overlap stay active.
    step = 8 * fold
    tb = min(max(block_rows, step), 16384)
    tb = (tb // step) * step
    rows = -(-B // step) * step
    if rows >= 2 * step:
        tb = min(tb, -(-rows // (2 * step)) * step)
    tb = min(tb, rows)
    Bp = -(-rows // tb) * tb
    if Bp != B:
        inputs = jnp.pad(inputs, ((0, Bp - B), (0, 0)))

    # Fold `fold` batch rows into one lane-dense row.  Kept f32: the bf16 cast
    # happens inside the kernel (no separate XLA cast pass / extra HBM stream).
    xf = inputs.reshape(Bp // fold, fold * obs)
    tbf = tb // fold
    grid = (Bp // tb,)

    row_spec = lambda shape: pl.BlockSpec(shape, lambda i: (i, 0))
    # VMEM-resident operands (constant index_map); total <0.7 MiB after the
    # super-block dedup, so the default double-buffering is harmless.
    res_spec = lambda arr: pl.BlockSpec(arr.shape, lambda i: (0, 0))

    kernel = functools.partial(_mlp_agent_kernel,
                               max_action=float(max_action),
                               return_logits=return_logits)

    out = pl.pallas_call(
        kernel,
        out_shape=jax.ShapeDtypeStruct((Bp // fold, fold * act), jnp.float32),
        grid=grid,
        in_specs=[row_spec((tbf, fold * obs)),
                  res_spec(w1), res_spec(w2c), res_spec(w3c), res_spec(w4),
                  res_spec(bpack)],
        out_specs=row_spec((tbf, fold * act)),
        compiler_params=pltpu.CompilerParams(
            dimension_semantics=("parallel",)),   # megacore batch sharding (v7x)
    )(xf, w1, w2c, w3c, w4, bpack)

    # (Bp/fold, fold*act) f32 row-major is bit-identical to (Bp, act): free reshape.
    actions = out.reshape(Bp, act)[:B]
    return {"actions": actions, "hidden_state": hidden_state}


def init_params(key, obs_dim, hidden_dim, action_dim):
    """Deterministic init; weights stored [in, out] for x @ W (nn.Linear is [out, in])."""
    dims = [(obs_dim, hidden_dim), (hidden_dim, hidden_dim),
            (hidden_dim, hidden_dim), (hidden_dim, action_dim)]
    names = ["fc1", "fc2", "fc3", "action_out"]
    params = {}
    for name, (din, dout) in zip(names, dims):
        key, kw, kb = jax.random.split(key, 3)
        bound = 1.0 / jnp.sqrt(din)  # matches nn.Linear default uniform bound
        w = jax.random.uniform(kw, (din, dout), jnp.float32, -bound, bound)
        b = jax.random.uniform(kb, (1, dout), jnp.float32, -bound, bound)
        params[name] = (w, b)
    return params


if __name__ == "__main__":
    # Module-implied feature shapes: obs_shape=16, rnn_hidden_dim=32,
    # action_shape=8, high_action=1.0.  Small ragged batch (300) exercises the
    # padding path and a 2-step batch grid.
    B, OBS, HID, ACT = 300, 16, 32, 8
    MAX_ACTION = 1.0

    key = jax.random.PRNGKey(0)
    key, kx = jax.random.split(key)
    x = jax.random.normal(kx, (B, OBS), jnp.float32)
    params = init_params(key, OBS, HID, ACT)
    folded = fold_params(params)
    hidden_state = jnp.zeros((1, HID), jnp.float32)  # init_hidden()

    out = mlp_agent_forward(x, folded, max_action=MAX_ACTION,
                            hidden_state=hidden_state, return_logits=False)
    actions = jax.block_until_ready(out["actions"])

    # Reference check in plain JAX (f32).
    def ref(x):
        h = jnp.maximum(x @ params["fc1"][0] + params["fc1"][1], 0.0)
        h = jnp.maximum(h @ params["fc2"][0] + params["fc2"][1], 0.0)
        h = jnp.maximum(h @ params["fc3"][0] + params["fc3"][1], 0.0)
        return MAX_ACTION * jnp.tanh(h @ params["action_out"][0] + params["action_out"][1])

    assert actions.shape == (B, ACT)
    # bf16 MXU path vs f32 reference -> loosened tolerance.
    assert jnp.allclose(actions, ref(x), atol=5e-2, rtol=5e-2), "mismatch vs reference"
    print("KERNEL_OK")
</pallas_src>

<mosaic_0001>
module attributes {stable_mosaic.version = 11 : i64} {
  func.func @_mlp_agent_kernel(%arg0: i32, %arg1: memref<16x256xf32, #tpu.memory_space<vmem>>, %arg2: memref<128x256xbf16, #tpu.memory_space<vmem>>, %arg3: memref<256x256xbf16, #tpu.memory_space<vmem>>, %arg4: memref<256x256xbf16, #tpu.memory_space<vmem>>, %arg5: memref<512x128xbf16, #tpu.memory_space<vmem>>, %arg6: memref<4x512xf32, #tpu.memory_space<vmem>>, %arg7: memref<16x128xf32, #tpu.memory_space<vmem>>) attributes {dimension_semantics = [#tpu.dimension_semantics<parallel>], iteration_bounds = array<i64: 2>, scalar_prefetch = 0 : i64, scratch_operands = 0 : i64, tpu.core_type = #tpu.core_type<tc>, window_params = [{transform_indices = @transform_0, window_bounds = array<i64: 16, 256>}, {pipeline_mode = #tpu.pipeline_mode<synchronous>, transform_indices = @transform_1, window_bounds = array<i64: 128, 256>}, {pipeline_mode = #tpu.pipeline_mode<synchronous>, transform_indices = @transform_2, window_bounds = array<i64: 256, 256>}, {pipeline_mode = #tpu.pipeline_mode<synchronous>, transform_indices = @transform_3, window_bounds = array<i64: 256, 256>}, {pipeline_mode = #tpu.pipeline_mode<synchronous>, transform_indices = @transform_4, window_bounds = array<i64: 512, 128>}, {pipeline_mode = #tpu.pipeline_mode<synchronous>, transform_indices = @transform_5, window_bounds = array<i64: 4, 512>}, {transform_indices = @transform_6, window_bounds = array<i64: 16, 128>}]} {
    %c0 = arith.constant 0 : index
    %c0_0 = arith.constant 0 : index
    %0 = vector.load %arg1[%c0, %c0_0] : memref<16x256xf32, #tpu.memory_space<vmem>>, vector<16x256xf32>
    %1 = arith.truncf %0 : vector<16x256xf32> to vector<16x256xbf16>
    %c0_1 = arith.constant 0 : index
    %c0_2 = arith.constant 0 : index
    %2 = vector.load %arg6[%c0_1, %c0_2] : memref<4x512xf32, #tpu.memory_space<vmem>>, vector<1x256xf32>
    %3 = vector.extract_strided_slice %1 {offsets = [0, 0], sizes = [16, 128], strides = [1, 1]} : vector<16x256xbf16> to vector<16x128xbf16>
    %c0_3 = arith.constant 0 : index
    %c0_4 = arith.constant 0 : index
    %4 = vector.load %arg2[%c0_3, %c0_4] : memref<128x256xbf16, #tpu.memory_space<vmem>>, vector<128x256xbf16>
    %cst = arith.constant dense<0.000000e+00> : vector<16x256xf32>
    %5 = tpu.matmul %3, %4, %cst {dimension_numbers = #tpu.dot_dimension_numbers<[1], [0], [0], [1], [0, 0, 1, 1], [], []>} : vector<16x128xbf16>, vector<128x256xbf16>, vector<16x256xf32> -> vector<16x256xf32>
    %6 = vector.broadcast %2 : vector<1x256xf32> to vector<16x256xf32>
    %7 = arith.addf %5, %6 : vector<16x256xf32>
    %8 = vector.extract_strided_slice %1 {offsets = [0, 128], sizes = [16, 128], strides = [1, 1]} : vector<16x256xbf16> to vector<16x128xbf16>
    %c0_5 = arith.constant 0 : index
    %c0_6 = arith.constant 0 : index
    %9 = vector.load %arg2[%c0_5, %c0_6] : memref<128x256xbf16, #tpu.memory_space<vmem>>, vector<128x256xbf16>
    %cst_7 = arith.constant dense<0.000000e+00> : vector<16x256xf32>
    %10 = tpu.matmul %8, %9, %cst_7 {dimension_numbers = #tpu.dot_dimension_numbers<[1], [0], [0], [1], [0, 0, 1, 1], [], []>} : vector<16x128xbf16>, vector<128x256xbf16>, vector<16x256xf32> -> vector<16x256xf32>
    %11 = vector.broadcast %2 : vector<1x256xf32> to vector<16x256xf32>
    %12 = arith.addf %10, %11 : vector<16x256xf32>
    %cst_8 = arith.constant 0.000000e+00 : f32
    %13 = vector.broadcast %cst_8 : f32 to vector<16x256xf32>
    %14 = arith.maximumf %7, %13 : vector<16x256xf32>
    %cst_9 = arith.constant 0.000000e+00 : f32
    %15 = vector.broadcast %cst_9 : f32 to vector<16x256xf32>
    %16 = arith.maximumf %12, %15 : vector<16x256xf32>
    %c1 = arith.constant 1 : index
    %c0_10 = arith.constant 0 : index
    %17 = vector.load %arg6[%c1, %c0_10] : memref<4x512xf32, #tpu.memory_space<vmem>>, vector<1x256xf32>
    %18 = arith.truncf %14 : vector<16x256xf32> to vector<16x256xbf16>
    %c0_11 = arith.constant 0 : index
    %c0_12 = arith.constant 0 : index
    %19 = vector.load %arg3[%c0_11, %c0_12] : memref<256x256xbf16, #tpu.memory_space<vmem>>, vector<256x256xbf16>
    %cst_13 = arith.constant dense<0.000000e+00> : vector<16x256xf32>
    %20 = tpu.matmul %18, %19, %cst_13 {dimension_numbers = #tpu.dot_dimension_numbers<[1], [0], [0], [1], [0, 0, 1, 1], [], []>} : vector<16x256xbf16>, vector<256x256xbf16>, vector<16x256xf32> -> vector<16x256xf32>
    %21 = vector.broadcast %17 : vector<1x256xf32> to vector<16x256xf32>
    %22 = arith.addf %20, %21 : vector<16x256xf32>
    %cst_14 = arith.constant 0.000000e+00 : f32
    %23 = vector.broadcast %cst_14 : f32 to vector<16x256xf32>
    %24 = arith.maximumf %22, %23 : vector<16x256xf32>
    %25 = arith.truncf %16 : vector<16x256xf32> to vector<16x256xbf16>
    %c0_15 = arith.constant 0 : index
    %c0_16 = arith.constant 0 : index
    %26 = vector.load %arg3[%c0_15, %c0_16] : memref<256x256xbf16, #tpu.memory_space<vmem>>, vector<256x256xbf16>
    %cst_17 = arith.constant dense<0.000000e+00> : vector<16x256xf32>
    %27 = tpu.matmul %25, %26, %cst_17 {dimension_numbers = #tpu.dot_dimension_numbers<[1], [0], [0], [1], [0, 0, 1, 1], [], []>} : vector<16x256xbf16>, vector<256x256xbf16>, vector<16x256xf32> -> vector<16x256xf32>
    %28 = vector.broadcast %17 : vector<1x256xf32> to vector<16x256xf32>
    %29 = arith.addf %27, %28 : vector<16x256xf32>
    %cst_18 = arith.constant 0.000000e+00 : f32
    %30 = vector.broadcast %cst_18 : f32 to vector<16x256xf32>
    %31 = arith.maximumf %29, %30 : vector<16x256xf32>
    %c2 = arith.constant 2 : index
    %c0_19 = arith.constant 0 : index
    %32 = vector.load %arg6[%c2, %c0_19] : memref<4x512xf32, #tpu.memory_space<vmem>>, vector<1x256xf32>
    %33 = arith.truncf %24 : vector<16x256xf32> to vector<16x256xbf16>
    %c0_20 = arith.constant 0 : index
    %c0_21 = arith.constant 0 : index
    %34 = vector.load %arg4[%c0_20, %c0_21] : memref<256x256xbf16, #tpu.memory_space<vmem>>, vector<256x256xbf16>
    %cst_22 = arith.constant dense<0.000000e+00> : vector<16x256xf32>
    %35 = tpu.matmul %33, %34, %cst_22 {dimension_numbers = #tpu.dot_dimension_numbers<[1], [0], [0], [1], [0, 0, 1, 1], [], []>} : vector<16x256xbf16>, vector<256x256xbf16>, vector<16x256xf32> -> vector<16x256xf32>
    %36 = vector.broadcast %32 : vector<1x256xf32> to vector<16x256xf32>
    %37 = arith.addf %35, %36 : vector<16x256xf32>
    %cst_23 = arith.constant 0.000000e+00 : f32
    %38 = vector.broadcast %cst_23 : f32 to vector<16x256xf32>
    %39 = arith.maximumf %37, %38 : vector<16x256xf32>
    %40 = arith.truncf %31 : vector<16x256xf32> to vector<16x256xbf16>
    %c0_24 = arith.constant 0 : index
    %c0_25 = arith.constant 0 : index
    %41 = vector.load %arg4[%c0_24, %c0_25] : memref<256x256xbf16, #tpu.memory_space<vmem>>, vector<256x256xbf16>
    %cst_26 = arith.constant dense<0.000000e+00> : vector<16x256xf32>
    %42 = tpu.matmul %40, %41, %cst_26 {dimension_numbers = #tpu.dot_dimension_numbers<[1], [0], [0], [1], [0, 0, 1, 1], [], []>} : vector<16x256xbf16>, vector<256x256xbf16>, vector<16x256xf32> -> vector<16x256xf32>
    %43 = vector.broadcast %32 : vector<1x256xf32> to vector<16x256xf32>
    %44 = arith.addf %42, %43 : vector<16x256xf32>
    %cst_27 = arith.constant 0.000000e+00 : f32
    %45 = vector.broadcast %cst_27 : f32 to vector<16x256xf32>
    %46 = arith.maximumf %44, %45 : vector<16x256xf32>
    %47 = tpu.concatenate %39, %46 in 1 : vector<16x256xf32>, vector<16x256xf32> -> vector<16x512xf32>
    %48 = arith.truncf %47 : vector<16x512xf32> to vector<16x512xbf16>
    %c0_28 = arith.constant 0 : index
    %c0_29 = arith.constant 0 : index
    %49 = vector.load %arg5[%c0_28, %c0_29] : memref<512x128xbf16, #tpu.memory_space<vmem>>, vector<512x128xbf16>
    %cst_30 = arith.constant dense<0.000000e+00> : vector<16x128xf32>
    %50 = tpu.matmul %48, %49, %cst_30 {dimension_numbers = #tpu.dot_dimension_numbers<[1], [0], [0], [1], [0, 0, 1, 1], [], []>} : vector<16x512xbf16>, vector<512x128xbf16>, vector<16x128xf32> -> vector<16x128xf32>
    %c3 = arith.constant 3 : index
    %c0_31 = arith.constant 0 : index
    %51 = vector.load %arg6[%c3, %c0_31] : memref<4x512xf32, #tpu.memory_space<vmem>>, vector<1x128xf32>
    %52 = vector.broadcast %51 : vector<1x128xf32> to vector<16x128xf32>
    %53 = arith.addf %50, %52 : vector<16x128xf32>
    %54 = math.tanh %53 : vector<16x128xf32>
    %cst_32 = arith.constant 1.000000e+00 : f32
    %55 = vector.broadcast %cst_32 : f32 to vector<16x128xf32>
    %56 = arith.mulf %55, %54 : vector<16x128xf32>
    %c0_33 = arith.constant 0 : index
    %c0_34 = arith.constant 0 : index
    %57 = vector.load %arg7[%c0_33, %c0_34] : memref<16x128xf32, #tpu.memory_space<vmem>>, vector<16x128xf32>
    tpu.vector_store %arg7[%c0_33, %c0_34], %56 {strides = array<i32>} : memref<16x128xf32, #tpu.memory_space<vmem>>, vector<16x128xf32>,
    return
  }
  func.func @transform_0(%arg0: i32) -> (i32, i32) {
    %c0_i32 = arith.constant 0 : i32
    %c0_i32_0 = arith.constant 0 : i32
    return %arg0, %c0_i32 : i32, i32
  }
  func.func @transform_1(%arg0: i32) -> (i32, i32) {
    %c0_i32 = arith.constant 0 : i32
    %c0_i32_0 = arith.constant 0 : i32
    %c0_i32_1 = arith.constant 0 : i32
    return %c0_i32, %c0_i32_0 : i32, i32
  }
  func.func @transform_2(%arg0: i32) -> (i32, i32) {
    %c0_i32 = arith.constant 0 : i32
    %c0_i32_0 = arith.constant 0 : i32
    %c0_i32_1 = arith.constant 0 : i32
    return %c0_i32, %c0_i32_0 : i32, i32
  }
  func.func @transform_3(%arg0: i32) -> (i32, i32) {
    %c0_i32 = arith.constant 0 : i32
    %c0_i32_0 = arith.constant 0 : i32
    %c0_i32_1 = arith.constant 0 : i32
    return %c0_i32, %c0_i32_0 : i32, i32
  }
  func.func @transform_4(%arg0: i32) -> (i32, i32) {
    %c0_i32 = arith.constant 0 : i32
    %c0_i32_0 = arith.constant 0 : i32
    %c0_i32_1 = arith.constant 0 : i32
    return %c0_i32, %c0_i32_0 : i32, i32
  }
  func.func @transform_5(%arg0: i32) -> (i32, i32) {
    %c0_i32 = arith.constant 0 : i32
    %c0_i32_0 = arith.constant 0 : i32
    %c0_i32_1 = arith.constant 0 : i32
    return %c0_i32, %c0_i32_0 : i32, i32
  }
  func.func @transform_6(%arg0: i32) -> (i32, i32) {
    %c0_i32 = arith.constant 0 : i32
    %c0_i32_0 = arith.constant 0 : i32
    return %arg0, %c0_i32 : i32, i32
  }
}

</mosaic_0001>

<bundles_post_ra>
// kernel: tpu_custom_call.1
= control target key start
LH: loop header
LB: loop body
LE: loop exit
PB: predicated region body
PF: predicated region fallthrough
CT: control target
= control target key end

     0   :  { %11 = vsyncpa [#allocation3], 0  ;;  %s2642_s0 = inlined_call_operand.hbm [shape: f32[32,256], index: 0, kind: input, shape index: {}]   ;;  %s2643_s1 = inlined_call_operand.hbm [shape: bf16[128,256], index: 1, kind: input, shape index: {}]   ;;  %s2644_s2 = inlined_call_operand.hbm [shape: bf16[256,256], index: 2, kind: input, shape index: {}]   ;;  %s2645_s3 = inlined_call_operand.hbm [shape: bf16[256,256], index: 3, kind: input, shape index: {}]   ;;  %s2646_s4 = inlined_call_operand.hbm [shape: bf16[512,128], index: 4, kind: input, shape index: {}]   ;;  %s2647_s5 = inlined_call_operand.vmem [shape: f32[4,512], index: 5, kind: input, shape index: {}]   ;;  %s2648_s6 = inlined_call_operand.hbm [shape: f32[32,128], index: 6, kind: output, shape index: {}]  }
   0x1   :  { %13 = vsyncpa [#allocation3 + $0x1], 0 }
   0x2   :  { %14 = vsyncpa [#allocation6], 0 }
   0x3   :  { %15 = vsyncpa [#allocation9], 0 }
   0x4   :  { %16 = vsyncpa [#allocation4], 0 }
   0x5   :  { %18 = vsyncpa [#allocation4 + $0x1], 0  ;;  %s2327_s21 = smov 0   ;;  %s2329_s22 = smov 0  }
   0x6   :  { %s2331_s23 = smov 0   ;;  %s2333_s24 = smov 0  }
   0x7 LB: > { %s2348_s25 = sadd.s32 4294967295, %s2275_s24   ;;  %s1622_s26 = sadd.s32 4294967294, %s2275_s24   ;;  %s2275_s24 = sphi %s2333_s24, %s2671_s24   ;;  %s2271_s23 = sphi %s2331_s23, %s2670_s23   ;;  %s2267_s22 = sphi %s2329_s22, %s2669_s22   ;;  %s2263_s21 = sphi %s2327_s21, %s2668_s21  }
   0x8   : > { %p44_p0 = scmp.ne.s32.totalorder %s2267_s22, %s2263_s21  ;;  %p2649_p1 = scmp.eq.s32.totalorder %s2348_s25, 0 }
   0x9   : > { %p179_p3 = scmp.eq.s32.totalorder %s1622_s26, 1  ;;  %p1623_p5 = scmp.ge.s32.totalorder %s2275_s24, 1 }
   0xa   : > { %p2357_p4 = por %p2649_p1, %p44_p0  ;;  %p186_p7 = scmp.lt.s32.totalorder %s2275_s24, 3 }
   0xb   : > { %p2362_p6 = por %p179_p3, %p44_p0  ;;  %s2277_s30 = smov [#allocation5]  }
   0xc   : > { %s2652_s27 = scalar_select %p2357_p4, 1, 0 }
   0xd   : > { %s2653_s28 = scalar_select %p2362_p6, 1, 0 }
   0xe   : > { %p2367_p8 = pnand %p1623_p5, %p186_p7  ;;  %s198_s7 = sshll.u32 %s2277_s30, 4  ;;  %s2371_s7 = int_to_ptr.vmem [resolvable:$true] %s198_s7 }
   0xf   : > { %s2278_s9 = smov [#allocation8]   ;;  %s2279_s11 = smov [#allocation7]  }
  0x10   : > { %s2654_s29 = scalar_select %p2367_p8, 1, 0 }
  0x11   : > { %p1827_p9 = pneg %p2367_p8  ;;  %s224_s10 = sshll.u32 %s2278_s9, 4  ;;  %s2382_s10 = int_to_ptr.vmem [resolvable:$true] %s224_s10 }
  0x12   : > { %s2384_s12 = sshll.u32 %s2279_s11, 4  ;;  %s2059_s15 = scalar_lea.hbm %s2643_s1, 2048  ;;  %s212_s12 = int_to_ptr.vmem [resolvable:$true] %s2384_s12 }
  0x13   : > { %p2378_p11 = pnand %p1827_p9, %p2649_p1  ;;  %p2060_p12 = scmp.ne.s32.totalorder %s2643_s1, %s2059_s15 }
  0x14   : > { %p2066_p5 = scmp.lt.u32.totalorder %s2059_s15, %s2643_s1 }
  0x15   : > { %p2394_p13 = pneg %p2378_p11 }
  0x17   : > { %p2062_p0 = pnand %p2394_p13, %p2060_p12 }
  0x19   : > { %p2063_p3 = pneg %p2062_p0 }
  0x1b   : > { %p2068_p7 = pnand %p2066_p5, %p2063_p3 }
  0x1d   : > { %2071 = shalt.err (!%p2068_p7)
}
  0x1e   : > { %s2072_s26 = scalar_lea.vmem %s2371_s7, 2048  ;;  %p2080_p2 = scmp.lt.s32.totalorder %s2371_s7, %s2371_s7 }
  0x1f   : > { %p2073_p9 = scmp.ne.s32.totalorder %s2371_s7, %s2072_s26  ;;  %p2081_p6 = scmp.lt.s32.totalorder %s2072_s26, %s2072_s26 }
  0x21   : > { %p2075_p10 = pnand %p2073_p9, %p2394_p13  ;;  %p2082_p12 = por %p2081_p6, %p2080_p2 }
  0x23   : > { %p2076_p1 = pneg %p2075_p10 }
  0x25   : > { %p2083_p0 = pnand %p2082_p12, %p2076_p1 }
  0x27   : > { %2086 = shalt.err (!%p2083_p0)
}
  0x28   : > { %s2280_s30 = smov 128   ;;  %s2281_s9 = smov 8  }
  0x29   : > { %1830 = dma.hbm_to_vmem [thread:$0]  (!%p2378_p11), %s2643_s1, 2048, %s2371_s7, [#allocation6], %s2280_s30, %s2280_s30, %s2281_s9  }
  0x2a   : > { %s2087_s16 = scalar_lea.hbm %s2645_s3, 4096 }
  0x2b   : > { %p2088_p1 = scmp.ne.s32.totalorder %s2645_s3, %s2087_s16  ;;  %p2094_p10 = scmp.lt.u32.totalorder %s2087_s16, %s2645_s3 }
  0x2d   : > { %p2090_p2 = pnand %p2088_p1, %p2394_p13 }
  0x2f   : > { %p2091_p6 = pneg %p2090_p2 }
  0x31   : > { %p2096_p3 = pnand %p2094_p10, %p2091_p6 }
  0x33   : > { %2099 = shalt.err (!%p2096_p3)
}
  0x34   : > { %s2100_s7 = scalar_lea.vmem %s2382_s10, 4096  ;;  %p2108_p12 = scmp.lt.s32.totalorder %s2382_s10, %s2382_s10 }
  0x35   : > { %p2101_p5 = scmp.ne.s32.totalorder %s2382_s10, %s2100_s7  ;;  %p2109_p0 = scmp.lt.s32.totalorder %s2100_s7, %s2100_s7 }
  0x37   : > { %p2103_p7 = pnand %p2101_p5, %p2394_p13  ;;  %p2110_p1 = por %p2109_p0, %p2108_p12 }
  0x39   : > { %p2104_p9 = pneg %p2103_p7 }
  0x3b   : > { %p2111_p2 = pnand %p2110_p1, %p2104_p9 }
  0x3d   : > { %2114 = shalt.err (!%p2111_p2)
}
  0x3e   : > { %1836 = dma.hbm_to_vmem [thread:$0]  (!%p2378_p11), %s2645_s3, 4096, %s2382_s10, [#allocation9], %s2280_s30, %s2280_s30, %s2281_s9  }
  0x3f   : > { %s2115_s16 = scalar_lea.hbm %s2644_s2, 4096 }
  0x40   : > { %p2116_p6 = scmp.ne.s32.totalorder %s2644_s2, %s2115_s16  ;;  %p2122_p5 = scmp.lt.u32.totalorder %s2115_s16, %s2644_s2 }
  0x42   : > { %p2118_p10 = pnand %p2116_p6, %p2394_p13 }
  0x44   : > { %p2119_p3 = pneg %p2118_p10 }
  0x46   : > { %p2124_p7 = pnand %p2122_p5, %p2119_p3 }
  0x48   : > { %2127 = shalt.err (!%p2124_p7)
}
  0x49   : > { %s2128_s7 = scalar_lea.vmem %s212_s12, 4096  ;;  %p2136_p1 = scmp.lt.s32.totalorder %s212_s12, %s212_s12 }
  0x4a   : > { %p2129_p9 = scmp.ne.s32.totalorder %s212_s12, %s2128_s7  ;;  %p2137_p2 = scmp.lt.s32.totalorder %s2128_s7, %s2128_s7 }
  0x4c   : > { %p2131_p12 = pnand %p2129_p9, %p2394_p13  ;;  %p2138_p4 = por %p2137_p2, %p2136_p1 }
  0x4e   : > { %p2132_p0 = pneg %p2131_p12 }
  0x50   : > { %p2139_p8 = pnand %p2138_p4, %p2132_p0 }
  0x52   : > { %2142 = shalt.err (!%p2139_p8)
}
  0x53   : > { %1833 = dma.hbm_to_vmem [thread:$0]  (!%p2378_p11), %s2644_s2, 4096, %s212_s12, [#allocation6], %s2280_s30, %s2280_s30, %s2281_s9  }
  0x54   : > { %s2282_s13 = smov [#allocation10]   ;;  %s2143_s17 = scalar_lea.hbm %s2646_s4, 4096 }
  0x55   : > { %s237_s14 = sshll.u32 %s2282_s13, 4  ;;  %p2144_p4 = scmp.ne.s32.totalorder %s2646_s4, %s2143_s17  ;;  %s238_s14 = int_to_ptr.vmem [resolvable:$true] %s237_s14 }
  0x56   : > { %p2150_p10 = scmp.lt.u32.totalorder %s2143_s17, %s2646_s4 }
  0x57   : > { %p2146_p8 = pnand %p2144_p4, %p2394_p13 }
  0x59   : > { %p2147_p6 = pneg %p2146_p8 }
  0x5b   : > { %p2152_p3 = pnand %p2150_p10, %p2147_p6 }
  0x5d   : > { %2155 = shalt.err (!%p2152_p3)
}
  0x5e   : > { %s2156_s12 = scalar_lea.vmem %s238_s14, 4096  ;;  %p2164_p12 = scmp.lt.s32.totalorder %s238_s14, %s238_s14 }
  0x5f   : > { %p2157_p5 = scmp.ne.s32.totalorder %s238_s14, %s2156_s12  ;;  %p2165_p0 = scmp.lt.s32.totalorder %s2156_s12, %s2156_s12 }
  0x61   : > { %p2159_p7 = pnand %p2157_p5, %p2394_p13  ;;  %p2166_p1 = por %p2165_p0, %p2164_p12 }
  0x63   : > { %p2160_p9 = pneg %p2159_p7 }
  0x65   : > { %p2167_p2 = pnand %p2166_p1, %p2160_p9 }
  0x67   : > { %2170 = shalt.err (!%p2167_p2)
}
  0x68   : > { %s2283_s30 = smov 64   ;;  %s2284_s18 = smov 4  }
  0x69   : > { %1839 = dma.hbm_to_vmem [thread:$0]  (!%p2378_p11), %s2646_s4, 4096, %s238_s14, [#allocation9], %s2283_s30, %s2283_s30, %s2284_s18  }
  0x6a   : > { %s2485_s11 = sadd.s32 1, %s2275_s24   ;;  %s31_s15 = sadd.s32 1, %s2271_s23 }
  0x6b   : > { %s28_s13 = ssub.s32 %s2275_s24, %s2485_s11  ;;  %p38_p4 = scmp.ne.s32.totalorder %s2271_s23, %s2267_s22 }
  0x6c   : > { %p29_p13 = scmp.eq.s32.totalorder %s28_s13, 0  ;;  %p39_p8 = scmp.eq.s32.totalorder %s2275_s24, 0 }
  0x6d   : > { %p2657_p10 = scmp.eq.s32.totalorder %s2348_s25, 1  ;;  %p1852_p5 = scmp.lt.s32.totalorder %s2275_s24, 2 }
  0x6e   : > { %s2494_s16 = scalar_select %p29_p13, %s2271_s23, %s31_s15  }
  0x6f   : > { %p40_p6 = por %p39_p8, %p38_p4  ;;  %p2498_p3 = por %p2657_p10, %p38_p4 }
  0x70   : > { %s254_s8 = sand.u32 1, %s2271_s23   ;;  %s1761_s14 = sshll.u32 %s2275_s24, 9 }
  0x71   : > { %s1629_s19 = sshll.u32 %s254_s8, 5  ;;  %s2508_s7 = scalar_lea.hbm %s2642_s0, %s1761_s14 }
  0x72   : > { %s258_s12 = scalar_lea.vmem [#allocation2], %s1629_s19  ;;  %p2512_p11 = pnand %p1852_p5, %p40_p6 }
  0x73   : > { %s266_s30 = sshll.u32 %s258_s12, 4  ;;  %s2516_s9 = scalar_lea.sflag [#allocation3], %s254_s8  ;;  %s2510_s30 = int_to_ptr.vmem [resolvable:$true] %s266_s30 }
  0x74   : > { %s2171_s10 = scalar_lea.hbm %s2508_s7, 512  ;;  %p2173_p9 = pneg %p2512_p11 }
  0x75   : > { %p2172_p7 = scmp.ne.s32.totalorder %s2508_s7, %s2171_s10  ;;  %s2176_s19 = scalar_lea.hbm %s2642_s0, 1024 }
  0x76   : > { %p2177_p1 = scmp.lt.u32.totalorder %s2508_s7, %s2642_s0  ;;  %p2178_p2 = scmp.lt.u32.totalorder %s2176_s19, %s2171_s10 }
  0x77   : > { %p2174_p12 = pnand %p2173_p9, %p2172_p7  ;;  %p2180_p4 = scmp.lt.u32.totalorder %s2171_s10, %s2508_s7 }
  0x78   : > { %p2179_p13 = por %p2178_p2, %p2177_p1 }
  0x79   : > { %p2175_p0 = pneg %p2174_p12 }
  0x7a   : > { %p2181_p8 = por %p2180_p4, %p2179_p13 }
  0x7c   : > { %p2182_p6 = pnand %p2181_p8, %p2175_p0 }
  0x7e   : > { %2185 = shalt.err (!%p2182_p6)
}
  0x7f   : > { %s2186_s8 = scalar_lea.vmem %s2510_s30, 512  ;;  %s2285_s26 = smov [#allocation2]  }
  0x80   : > { %p2187_p10 = scmp.ne.s32.totalorder %s2510_s30, %s2186_s8  ;;  %s2191_s12 = sshll.u32 %s2285_s26, 4  ;;  %s2192_s12 = int_to_ptr.vmem [resolvable:$false] %s2191_s12 }
  0x81   : > { %s2193_s13 = scalar_lea.vmem %s2192_s12, 1024  ;;  %p2194_p12 = scmp.lt.s32.totalorder %s2510_s30, %s2192_s12 }
  0x82   : > { %p2189_p5 = pnand %p2187_p10, %p2173_p9  ;;  %p2195_p1 = scmp.lt.s32.totalorder %s2193_s13, %s2186_s8 }
  0x84   : > { %p2190_p7 = pneg %p2189_p5  ;;  %p2196_p2 = por %p2195_p1, %p2194_p12 }
  0x86   : > { %p2197_p13 = pnand %p2196_p2, %p2190_p7 }
  0x88   : > { %2200 = shalt.err (!%p2197_p13)
}
  0x89   : > { %s2286_s10 = smov 256   ;;  %s2287_s15 = smov 16  }
  0x8a   : > { %1843 = dma.hbm_to_vmem [thread:$0]  (!%p2512_p11), %s2508_s7, 512, %s2510_s30, %s2516_s9, %s2286_s10, %s2286_s10, %s2287_s15  }
  0x8b   : > { %p2660_p9 = scmp.ne.s32.totalorder %s2654_s29, 0 }
  0x8c   : > { %s2547_s19 = sand.u32 (!%p2660_p9), 1, %s2267_s22   ;;  %p2661_p0 = scmp.ne.s32.totalorder (!%p2660_p9), %s2652_s27, 0 }
  0x8d   : > { %278 = sbr.rel (%p2660_p9) target bundleno = 1103 (0x44f), region = 44  ;;  %s1634_s14 = sshll.u32 (!%p2660_p9), %s2547_s19, 5 }
  0x8e   : > { %s281_s20 = scalar_lea.sflag (!%p2660_p9), [#allocation3], %s2547_s19  ;;  %s2551_s8 = scalar_lea.vmem (!%p2660_p9), [#allocation2], %s1634_s14 }
  0x94   : > { %2246 = dma.done.wait (%p2661_p0), %s281_s20, 512  }
  0x95   : > { %2248 = vsyncadd (%p2661_p0), %s281_s20, 4294966784  ;;  %p2662_p11 = scmp.eq.s32.totalorder %s2348_s25, 0 }
  0x97   : > { %2250 = dma.done.wait (%p2662_p11), [#allocation6], 6144   ;;  %p2663_p4 = pmov %p2662_p11 }
  0x99   : > { %2252 = vsyncadd (%p2663_p4), [#allocation6], 4294961152  ;;  %p2664_p8 = pmov %p2663_p4 }
  0x9a   : > { %p2665_p6 = pmov %p2663_p4 }
  0x9b   : > { %2254 = dma.done.wait (%p2664_p8), [#allocation9], 8192  }
  0x9c   : > { %2256 = vsyncadd (%p2665_p6), [#allocation9], 4294959104  ;;  %v2288_v0 = vmov 0   ;;  %v1903_v1 = vld [vmem:[#allocation5 + $0x4] ss:$8 sps:$4 sm:$0xff]   ;;  %v334_v18 = vld [vmem:[%s2551_s8 + $0x10] sm:$0xff]  ;;  %v356_v56 = vlaneseq }
  0x9d   : > { %478 = vmatprep.mubr.bf16.mxu0 %v2288_v0  ;;  %521 = vmatprep.mubr.bf16.mxu1 %v2288_v0  ;;  %v1905_v2 = vld [vmem:[#allocation5] ss:$8 sps:$4 sm:$0xff]   ;;  %v1906_v3 = vld [vmem:[#allocation5 + $0x14] ss:$8 sps:$4 sm:$0xff]   ;;  %v1908_v4 = vld [vmem:[#allocation5 + $0x10] ss:$8 sps:$4 sm:$0xff]  }
  0x9e   : > { %446 = vmatprep.subr.bf16.mxu0 %v1903_v1  ;;  %489 = vmatprep.subr.bf16.mxu1 %v1903_v1  ;;  %v1909_v5 = vld [vmem:[#allocation5 + $0x24] ss:$8 sps:$4 sm:$0xff]   ;;  %v1911_v6 = vld [vmem:[#allocation5 + $0x20] ss:$8 sps:$4 sm:$0xff]   ;;  %v1912_v7 = vld [vmem:[#allocation5 + $0x34] ss:$8 sps:$4 sm:$0xff]  }
  0x9f   : > { %447 = vmatpush1.bf16.msra.mxu0 %v1905_v2  ;;  %490 = vmatpush1.bf16.msra.mxu1 %v1905_v2  ;;  %v1914_v8 = vld [vmem:[#allocation5 + $0x30] ss:$8 sps:$4 sm:$0xff]   ;;  %v1915_v9 = vld [vmem:[#allocation5 + $0x44] ss:$8 sps:$4 sm:$0xff]   ;;  %v1917_v10 = vld [vmem:[#allocation5 + $0x40] ss:$8 sps:$4 sm:$0xff]  }
  0xa0   : > { %448 = vmatprep.subr.bf16.mxu0 %v1906_v3  ;;  %491 = vmatprep.subr.bf16.mxu1 %v1906_v3  ;;  %v1918_v11 = vld [vmem:[#allocation5 + $0x54] ss:$8 sps:$4 sm:$0xff]   ;;  %v1920_v12 = vld [vmem:[#allocation5 + $0x50] ss:$8 sps:$4 sm:$0xff]   ;;  %v1921_v13 = vld [vmem:[#allocation5 + $0x64] ss:$8 sps:$4 sm:$0xff]  }
  0xa1   : > { %v1923_v14 = vld [vmem:[#allocation5 + $0x60] ss:$8 sps:$4 sm:$0xff]   ;;  %v1924_v15 = vld [vmem:[#allocation5 + $0x74] ss:$8 sps:$4 sm:$0xff]   ;;  %v1926_v16 = vld [vmem:[#allocation5 + $0x70] ss:$8 sps:$4 sm:$0xff]  }
  0xa2   : > { %v332_v17 = vld [vmem:[%s2551_s8] sm:$0xff]  ;;  %v333_v19 = vld [vmem:[%s2551_s8 + $0x8] sm:$0xff]  ;;  %v335_v20 = vld [vmem:[%s2551_s8 + $0x18] sm:$0xff]  ;;  %v357_v57 = vshrl.u32 %v356_v56, 7  ;;  %s1639_s13 = sshll.u32 %s2547_s19, 4  ;;  %s1762_s10 = sshll.u32 %s2348_s25, 8 }
  0xa3   : > { %449 = vmatpush1.bf16.msra.mxu0 %v1908_v4  ;;  %492 = vmatpush1.bf16.msra.mxu1 %v1908_v4  ;;  %v1929_v21 = vld [vmem:[#allocation7 + $0x4] ss:$8 sps:$4 sm:$0xff]   ;;  %v336_v22 = vpack.c.bf16 %v334_v18, %v332_v17  ;;  %v337_v23 = vpack.c.bf16 %v335_v20, %v333_v19  ;;  %v1927_v24 = vld [vmem:[#allocation7] ss:$8 sps:$4 sm:$0xff]   ;;  %v1932_v25 = vld [vmem:[#allocation7 + $0x14] ss:$8 sps:$4 sm:$0xff]   ;;  %s2596_s27 = scalar_lea.hbm %s2648_s6, %s1762_s10 }
  0xa4   : > { %450 = vmatprep.subr.bf16.mxu0 %v1909_v5  ;;  %493 = vmatprep.subr.bf16.mxu1 %v1909_v5  ;;  %v1930_v26 = vld [vmem:[#allocation7 + $0x10] ss:$8 sps:$4 sm:$0xff]   ;;  %v1935_v27 = vld [vmem:[#allocation7 + $0x24] ss:$8 sps:$4 sm:$0xff]   ;;  %v1933_v28 = vld [vmem:[#allocation7 + $0x20] ss:$8 sps:$4 sm:$0xff]  }
  0xa5   : > { %v1938_v29 = vld [vmem:[#allocation7 + $0x34] ss:$8 sps:$4 sm:$0xff]   ;;  %v1936_v30 = vld [vmem:[#allocation7 + $0x30] ss:$8 sps:$4 sm:$0xff]   ;;  %v1941_v31 = vld [vmem:[#allocation7 + $0x44] ss:$8 sps:$4 sm:$0xff]  }
  0xa6   : > { %v1939_v32 = vld [vmem:[#allocation7 + $0x40] ss:$8 sps:$4 sm:$0xff]   ;;  %v1944_v33 = vld [vmem:[#allocation7 + $0x54] ss:$8 sps:$4 sm:$0xff]   ;;  %v1942_v34 = vld [vmem:[#allocation7 + $0x50] ss:$8 sps:$4 sm:$0xff]  }
  0xa7   : > { %451 = vmatpush1.bf16.msra.mxu0 %v1911_v6  ;;  %494 = vmatpush1.bf16.msra.mxu1 %v1911_v6  ;;  %v1947_v35 = vld [vmem:[#allocation7 + $0x64] ss:$8 sps:$4 sm:$0xff]   ;;  %v1945_v36 = vld [vmem:[#allocation7 + $0x60] ss:$8 sps:$4 sm:$0xff]   ;;  %v1950_v37 = vld [vmem:[#allocation7 + $0x74] ss:$8 sps:$4 sm:$0xff]  }
  0xa8   : > { %452 = vmatprep.subr.bf16.mxu0 %v1912_v7  ;;  %495 = vmatprep.subr.bf16.mxu1 %v1912_v7  ;;  %v1948_v38 = vld [vmem:[#allocation7 + $0x70] ss:$8 sps:$4 sm:$0xff]   ;;  %v1953_v39 = vld [vmem:[#allocation7 + $0x84] ss:$8 sps:$4 sm:$0xff]   ;;  %v1951_v40 = vld [vmem:[#allocation7 + $0x80] ss:$8 sps:$4 sm:$0xff]  }
  0xa9   : > { %v1956_v41 = vld [vmem:[#allocation7 + $0x94] ss:$8 sps:$4 sm:$0xff]   ;;  %v1954_v42 = vld [vmem:[#allocation7 + $0x90] ss:$8 sps:$4 sm:$0xff]   ;;  %v1959_v43 = vld [vmem:[#allocation7 + $0xa4] ss:$8 sps:$4 sm:$0xff]  }
  0xaa   : > { %v1957_v44 = vld [vmem:[#allocation7 + $0xa0] ss:$8 sps:$4 sm:$0xff]   ;;  %v1962_v45 = vld [vmem:[#allocation7 + $0xb4] ss:$8 sps:$4 sm:$0xff]   ;;  %v1960_v46 = vld [vmem:[#allocation7 + $0xb0] ss:$8 sps:$4 sm:$0xff]  }
  0xab   : > { %453 = vmatpush1.bf16.msra.mxu0 %v1914_v8  ;;  %496 = vmatpush1.bf16.msra.mxu1 %v1914_v8  ;;  %v1965_v47 = vld [vmem:[#allocation7 + $0xc4] ss:$8 sps:$4 sm:$0xff]   ;;  %v1963_v48 = vld [vmem:[#allocation7 + $0xc0] ss:$8 sps:$4 sm:$0xff]   ;;  %v1968_v49 = vld [vmem:[#allocation7 + $0xd4] ss:$8 sps:$4 sm:$0xff]  }
  0xac   : > { %454 = vmatprep.subr.bf16.mxu0 %v1915_v9  ;;  %497 = vmatprep.subr.bf16.mxu1 %v1915_v9  ;;  %v1966_v50 = vld [vmem:[#allocation7 + $0xd0] ss:$8 sps:$4 sm:$0xff]   ;;  %v1971_v51 = vld [vmem:[#allocation7 + $0xe4] ss:$8 sps:$4 sm:$0xff]   ;;  %v1969_v52 = vld [vmem:[#allocation7 + $0xe0] ss:$8 sps:$4 sm:$0xff]  }
  0xad   : > { %v1974_v53 = vld [vmem:[#allocation7 + $0xf4] ss:$8 sps:$4 sm:$0xff]   ;;  %v1972_v54 = vld [vmem:[#allocation7 + $0xf0] ss:$8 sps:$4 sm:$0xff]   ;;  %v1977_v55 = vld [vmem:[#allocation8 + $0x4] ss:$8 sps:$4 sm:$0xff]  }
  0xae   : > { %v2569_v58 = vsub.s32 0, %v357_v57  ;;  %v338_v59 = vld [vmem:[%s2647_s5] ss:$4 sm:$0x3]  ;;  %v2574_v60 = vsub.s32 1, %v357_v57  ;;  %s328_s15 = scalar_lea.vmem [#allocation11], %s1639_s13 }
  0xaf   : > { %455 = vmatpush1.bf16.msra.mxu0 %v1917_v10  ;;  %498 = vmatpush1.bf16.msra.mxu1 %v1917_v10  ;;  %v2022_v56 = vld [vmem:[#allocation8 + $0xf4] ss:$8 sps:$4 sm:$0xff]   ;;  %v2020_v57 = vld [vmem:[#allocation8 + $0xf0] ss:$8 sps:$4 sm:$0xff]   ;;  %s1511_s14 = sshll.u32 %s328_s15, 4  ;;  %s1498_s29 = scalar_lea.sflag [#allocation4], %s2547_s19  ;;  %s2598_s14 = int_to_ptr.vmem [resolvable:$true] %s1511_s14 }
  0xb0   : > { %456 = vmatprep.subr.bf16.mxu0 %v1918_v11  ;;  %499 = vmatprep.subr.bf16.mxu1 %v1918_v11  ;;  %v359_v61 = vrot.slane %v338_v59, %v2569_v58  ;;  %v363_v62 = vrot.slane %v338_v59, %v2574_v60  ;;  %v2023_v59 = vld [vmem:[#allocation10 + $0x40] sm:$0xff]   ;;  %s2201_s7 = scalar_lea.vmem %s2598_s14, 256  ;;  %s2289_s25 = smov [#allocation11]  }
  0xb1   : > { %p2202_p10 = scmp.ne.s32.totalorder %s2598_s14, %s2201_s7  ;;  %s2205_s30 = sshll.u32 %s2289_s25, 4  ;;  %s2206_s30 = int_to_ptr.vmem [resolvable:$false] %s2205_s30 }
  0xb2   : > { %s2207_s18 = scalar_lea.vmem %s2206_s30, 512  ;;  %p2208_p12 = scmp.lt.s32.totalorder %s2598_s14, %s2206_s30 }
  0xb3   : > { %457 = vmatpush1.bf16.msra.mxu0 %v1920_v12  ;;  %500 = vmatpush1.bf16.msra.mxu1 %v1920_v12  ;;  %p2203_p5 = pnand %p2202_p10, %p2498_p3  ;;  %p2209_p1 = scmp.lt.s32.totalorder %s2207_s18, %s2201_s7 }
  0xb4   : > { %458 = vmatprep.subr.bf16.mxu0 %v1921_v13  ;;  %501 = vmatprep.subr.bf16.mxu1 %v1921_v13 }
  0xb5   : > { %p2204_p7 = pneg %p2203_p5  ;;  %p2210_p2 = por %p2209_p1, %p2208_p12 }
  0xb7   : > { %459 = vmatpush1.bf16.msra.mxu0 %v1923_v14  ;;  %502 = vmatpush1.bf16.msra.mxu1 %v1923_v14  ;;  %p2211_p13 = pnand %p2210_p2, %p2204_p7 }
  0xb8   : > { %460 = vmatprep.subr.bf16.mxu0 %v1924_v15  ;;  %503 = vmatprep.subr.bf16.mxu1 %v1924_v15 }
  0xbb   : > { %461 = vmatpush1.bf16.msra.mxu0 %v1926_v16  ;;  %504 = vmatpush1.bf16.msra.mxu1 %v1926_v16 }
  0xbc   : > { %747 = vmatprep.subr.bf16.mxu0 %v1929_v21  ;;  %796 = vmatprep.subr.bf16.mxu1 %v1929_v21 }
  0xbe   : > { %479 = vmatmul.mubr.bf16.vlgmr.msra.gmra.mrb[0].mxu0 %v336_v22  ;;  %522 = vmatmul.mubr.bf16.vlgmr.msra.gmra.mrb[0].mxu1 %v337_v23 }
  0xbf   : > { %748 = vmatpush1.bf16.msra.mxu0 %v1927_v24  ;;  %797 = vmatpush1.bf16.msra.mxu1 %v1927_v24 }
  0xc0   : > { %749 = vmatprep.subr.bf16.mxu0 %v1932_v25  ;;  %798 = vmatprep.subr.bf16.mxu1 %v1932_v25 }
  0xc3   : > { %750 = vmatpush1.bf16.msra.mxu0 %v1930_v26  ;;  %799 = vmatpush1.bf16.msra.mxu1 %v1930_v26 }
  0xc4   : > { %751 = vmatprep.subr.bf16.mxu0 %v1935_v27  ;;  %800 = vmatprep.subr.bf16.mxu1 %v1935_v27  ;;  %v1975_v27 = vld [vmem:[#allocation8] ss:$8 sps:$4 sm:$0xff]  }
  0xc7   : > { %752 = vmatpush1.bf16.msra.mxu0 %v1933_v28  ;;  %801 = vmatpush1.bf16.msra.mxu1 %v1933_v28  ;;  %v1980_v28 = vld [vmem:[#allocation8 + $0x14] ss:$8 sps:$4 sm:$0xff]  }
  0xc8   : > { %753 = vmatprep.subr.bf16.mxu0 %v1938_v29  ;;  %802 = vmatprep.subr.bf16.mxu1 %v1938_v29  ;;  %v1978_v29 = vld [vmem:[#allocation8 + $0x10] ss:$8 sps:$4 sm:$0xff]  }
  0xcb   : > { %754 = vmatpush1.bf16.msra.mxu0 %v1936_v30  ;;  %803 = vmatpush1.bf16.msra.mxu1 %v1936_v30  ;;  %v1983_v30 = vld [vmem:[#allocation8 + $0x24] ss:$8 sps:$4 sm:$0xff]  }
  0xcc   : > { %755 = vmatprep.subr.bf16.mxu0 %v1941_v31  ;;  %804 = vmatprep.subr.bf16.mxu1 %v1941_v31  ;;  %v1981_v31 = vld [vmem:[#allocation8 + $0x20] ss:$8 sps:$4 sm:$0xff]  }
  0xcf   : > { %756 = vmatpush1.bf16.msra.mxu0 %v1939_v32  ;;  %805 = vmatpush1.bf16.msra.mxu1 %v1939_v32  ;;  %v1986_v32 = vld [vmem:[#allocation8 + $0x34] ss:$8 sps:$4 sm:$0xff]  }
  0xd0   : > { %757 = vmatprep.subr.bf16.mxu0 %v1944_v33  ;;  %806 = vmatprep.subr.bf16.mxu1 %v1944_v33  ;;  %v1984_v33 = vld [vmem:[#allocation8 + $0x30] ss:$8 sps:$4 sm:$0xff]  }
  0xd3   : > { %758 = vmatpush1.bf16.msra.mxu0 %v1942_v34  ;;  %807 = vmatpush1.bf16.msra.mxu1 %v1942_v34  ;;  %v1989_v34 = vld [vmem:[#allocation8 + $0x44] ss:$8 sps:$4 sm:$0xff]  }
  0xd4   : > { %759 = vmatprep.subr.bf16.mxu0 %v1947_v35  ;;  %808 = vmatprep.subr.bf16.mxu1 %v1947_v35  ;;  %v1987_v35 = vld [vmem:[#allocation8 + $0x40] ss:$8 sps:$4 sm:$0xff]  }
  0xd7   : > { %760 = vmatpush1.bf16.msra.mxu0 %v1945_v36  ;;  %809 = vmatpush1.bf16.msra.mxu1 %v1945_v36  ;;  %v1992_v36 = vld [vmem:[#allocation8 + $0x54] ss:$8 sps:$4 sm:$0xff]  }
  0xd8   : > { %761 = vmatprep.subr.bf16.mxu0 %v1950_v37  ;;  %810 = vmatprep.subr.bf16.mxu1 %v1950_v37  ;;  %v1990_v37 = vld [vmem:[#allocation8 + $0x50] ss:$8 sps:$4 sm:$0xff]  }
  0xdb   : > { %762 = vmatpush1.bf16.msra.mxu0 %v1948_v38  ;;  %811 = vmatpush1.bf16.msra.mxu1 %v1948_v38  ;;  %v1995_v38 = vld [vmem:[#allocation8 + $0x64] ss:$8 sps:$4 sm:$0xff]  }
  0xdc   : > { %763 = vmatprep.subr.bf16.mxu0 %v1953_v39  ;;  %812 = vmatprep.subr.bf16.mxu1 %v1953_v39  ;;  %v1993_v39 = vld [vmem:[#allocation8 + $0x60] ss:$8 sps:$4 sm:$0xff]  }
  0xdf   : > { %764 = vmatpush1.bf16.msra.mxu0 %v1951_v40  ;;  %813 = vmatpush1.bf16.msra.mxu1 %v1951_v40  ;;  %v1998_v40 = vld [vmem:[#allocation8 + $0x74] ss:$8 sps:$4 sm:$0xff]  }
  0xe0   : > { %765 = vmatprep.subr.bf16.mxu0 %v1956_v41  ;;  %814 = vmatprep.subr.bf16.mxu1 %v1956_v41  ;;  %v1996_v41 = vld [vmem:[#allocation8 + $0x70] ss:$8 sps:$4 sm:$0xff]  }
  0xe3   : > { %766 = vmatpush1.bf16.msra.mxu0 %v1954_v42  ;;  %815 = vmatpush1.bf16.msra.mxu1 %v1954_v42  ;;  %v2001_v42 = vld [vmem:[#allocation8 + $0x84] ss:$8 sps:$4 sm:$0xff]  }
  0xe4   : > { %767 = vmatprep.subr.bf16.mxu0 %v1959_v43  ;;  %816 = vmatprep.subr.bf16.mxu1 %v1959_v43  ;;  %v1999_v43 = vld [vmem:[#allocation8 + $0x80] ss:$8 sps:$4 sm:$0xff]  }
  0xe7   : > { %768 = vmatpush1.bf16.msra.mxu0 %v1957_v44  ;;  %817 = vmatpush1.bf16.msra.mxu1 %v1957_v44  ;;  %v2004_v44 = vld [vmem:[#allocation8 + $0x94] ss:$8 sps:$4 sm:$0xff]  }
  0xe8   : > { %769 = vmatprep.subr.bf16.mxu0 %v1962_v45  ;;  %818 = vmatprep.subr.bf16.mxu1 %v1962_v45  ;;  %v2002_v45 = vld [vmem:[#allocation8 + $0x90] ss:$8 sps:$4 sm:$0xff]  }
  0xeb   : > { %770 = vmatpush1.bf16.msra.mxu0 %v1960_v46  ;;  %819 = vmatpush1.bf16.msra.mxu1 %v1960_v46  ;;  %v2007_v46 = vld [vmem:[#allocation8 + $0xa4] ss:$8 sps:$4 sm:$0xff]  }
  0xec   : > { %771 = vmatprep.subr.bf16.mxu0 %v1965_v47  ;;  %820 = vmatprep.subr.bf16.mxu1 %v1965_v47  ;;  %v2005_v47 = vld [vmem:[#allocation8 + $0xa0] ss:$8 sps:$4 sm:$0xff]  }
  0xef   : > { %772 = vmatpush1.bf16.msra.mxu0 %v1963_v48  ;;  %821 = vmatpush1.bf16.msra.mxu1 %v1963_v48  ;;  %v2010_v48 = vld [vmem:[#allocation8 + $0xb4] ss:$8 sps:$4 sm:$0xff]  }
  0xf0   : > { %773 = vmatprep.subr.bf16.mxu0 %v1968_v49  ;;  %822 = vmatprep.subr.bf16.mxu1 %v1968_v49  ;;  %v2008_v49 = vld [vmem:[#allocation8 + $0xb0] ss:$8 sps:$4 sm:$0xff]  }
  0xf3   : > { %774 = vmatpush1.bf16.msra.mxu0 %v1966_v50  ;;  %823 = vmatpush1.bf16.msra.mxu1 %v1966_v50  ;;  %v2013_v50 = vld [vmem:[#allocation8 + $0xc4] ss:$8 sps:$4 sm:$0xff]  }
  0xf4   : > { %775 = vmatprep.subr.bf16.mxu0 %v1971_v51  ;;  %824 = vmatprep.subr.bf16.mxu1 %v1971_v51  ;;  %v2011_v51 = vld [vmem:[#allocation8 + $0xc0] ss:$8 sps:$4 sm:$0xff]  }
  0xf7   : > { %776 = vmatpush1.bf16.msra.mxu0 %v1969_v52  ;;  %825 = vmatpush1.bf16.msra.mxu1 %v1969_v52  ;;  %v2016_v52 = vld [vmem:[#allocation8 + $0xd4] ss:$8 sps:$4 sm:$0xff]  }
  0xf8   : > { %777 = vmatprep.subr.bf16.mxu0 %v1974_v53  ;;  %826 = vmatprep.subr.bf16.mxu1 %v1974_v53  ;;  %v2014_v53 = vld [vmem:[#allocation8 + $0xd0] ss:$8 sps:$4 sm:$0xff]  }
  0xfb   : > { %778 = vmatpush1.bf16.msra.mxu0 %v1972_v54  ;;  %827 = vmatpush1.bf16.msra.mxu1 %v1972_v54  ;;  %v2019_v54 = vld [vmem:[#allocation8 + $0xe4] ss:$8 sps:$4 sm:$0xff]  }
  0xfc   : > { %1050 = vmatprep.subr.bf16.mxu0 %v1977_v55  ;;  %1099 = vmatprep.subr.bf16.mxu1 %v1977_v55  ;;  %v2017_v55 = vld [vmem:[#allocation8 + $0xe0] ss:$8 sps:$4 sm:$0xff]  }
 0x191   : > { %v480_v63 = vpop.f32.mrb[0].mxu0  ;;  %v523_v0 = vpop.f32.mrb[0].mxu1 }
 0x192   : > { %v481_v1 = vadd.f32 %v480_v63, %v359_v61  ;;  %v524_v2 = vadd.f32 %v523_v0, %v359_v61  ;;  %v482_v3 = vpop.f32.mrb[1].mxu0  ;;  %v525_v4 = vpop.f32.mrb[1].mxu1 }
 0x193   : > { %v483_v5 = vadd.f32 %v482_v3, %v363_v62  ;;  %v526_v6 = vadd.f32 %v525_v4, %v363_v62  ;;  %v484_v7 = vpop.f32.mrb[2].mxu0  ;;  %v527_v8 = vpop.f32.mrb[2].mxu1 }
 0x194   : > { %v536_v9 = vmax.f32 %v524_v2, 0.0  ;;  %v485_v10 = vadd.f32 %v484_v7, %v359_v61  ;;  %v528_v11 = vadd.f32 %v527_v8, %v359_v61  ;;  %v486_v12 = vpop.f32.mrb[3].mxu0  ;;  %v529_v13 = vpop.f32.mrb[3].mxu1  ;;  %v532_v17 = vmax.f32 %v481_v1, 0.0  ;;  %v2024_v61 = vld [vmem:[#allocation10 + $0xc0] sm:$0xff]  }
 0x195   : > { %v537_v14 = vmax.f32 %v526_v6, 0.0  ;;  %v487_v15 = vadd.f32 %v486_v12, %v363_v62  ;;  %v530_v16 = vadd.f32 %v529_v13, %v363_v62  ;;  %v533_v20 = vmax.f32 %v483_v5, 0.0  ;;  %v1656_v62 = vld [vmem:[%s2647_s5 + $0x1] ss:$4 sm:$0x3] }
 0x196   : > { %v534_v18 = vmax.f32 %v485_v10, 0.0  ;;  %v538_v19 = vmax.f32 %v528_v11, 0.0  ;;  %v580_v63 = vrot.slane %v1656_v62, %v2569_v58  ;;  %v584_v0 = vrot.slane %v1656_v62, %v2574_v60 }
 0x197   : > { %v535_v21 = vmax.f32 %v487_v15, 0.0  ;;  %v539_v22 = vmax.f32 %v530_v16, 0.0 }
 0x198   : > { %v542_v23 = vpack.c.bf16 %v534_v18, %v532_v17  ;;  %v794_v24 = vpack.c.bf16 %v538_v19, %v536_v9 }
 0x199   : > { %v543_v25 = vpack.c.bf16 %v535_v21, %v533_v20  ;;  %v795_v26 = vpack.c.bf16 %v539_v22, %v537_v14 }
 0x19b   : > { %779 = vmatprep.mubr.bf16.mxu0 %v543_v25  ;;  %828 = vmatprep.mubr.bf16.mxu1 %v795_v26 }
 0x19c   : > { %780 = vmatmul.mubr.bf16.vlgmr.msra.gmra.mrb[4].mxu0 %v542_v23  ;;  %829 = vmatmul.mubr.bf16.vlgmr.msra.gmra.mrb[4].mxu1 %v794_v24 }
 0x19d   : > { %1051 = vmatpush1.bf16.msra.mxu0 %v1975_v27  ;;  %1100 = vmatpush1.bf16.msra.mxu1 %v1975_v27 }
 0x19e   : > { %1052 = vmatprep.subr.bf16.mxu0 %v1980_v28  ;;  %1101 = vmatprep.subr.bf16.mxu1 %v1980_v28 }
 0x1a1   : > { %1053 = vmatpush1.bf16.msra.mxu0 %v1978_v29  ;;  %1102 = vmatpush1.bf16.msra.mxu1 %v1978_v29  ;;  %v2025_v29 = vld [vmem:[#allocation10] sm:$0xff]  }
 0x1a2   : > { %1054 = vmatprep.subr.bf16.mxu0 %v1983_v30  ;;  %1103 = vmatprep.subr.bf16.mxu1 %v1983_v30  ;;  %v2026_v30 = vld [vmem:[#allocation10 + $0x80] sm:$0xff]  }
 0x1a5   : > { %1055 = vmatpush1.bf16.msra.mxu0 %v1981_v31  ;;  %1104 = vmatpush1.bf16.msra.mxu1 %v1981_v31  ;;  %v2027_v31 = vld [vmem:[#allocation10 + $0x48] sm:$0xff]  }
 0x1a6   : > { %1056 = vmatprep.subr.bf16.mxu0 %v1986_v32  ;;  %1105 = vmatprep.subr.bf16.mxu1 %v1986_v32  ;;  %v2028_v32 = vld [vmem:[#allocation10 + $0xc8] sm:$0xff]  }
 0x1a9   : > { %1057 = vmatpush1.bf16.msra.mxu0 %v1984_v33  ;;  %1106 = vmatpush1.bf16.msra.mxu1 %v1984_v33  ;;  %v2029_v33 = vld [vmem:[#allocation10 + $0x8] sm:$0xff]  }
 0x1aa   : > { %1058 = vmatprep.subr.bf16.mxu0 %v1989_v34  ;;  %1107 = vmatprep.subr.bf16.mxu1 %v1989_v34  ;;  %v2030_v34 = vld [vmem:[#allocation10 + $0x88] sm:$0xff]  }
 0x1ad   : > { %1059 = vmatpush1.bf16.msra.mxu0 %v1987_v35  ;;  %1108 = vmatpush1.bf16.msra.mxu1 %v1987_v35  ;;  %v2031_v35 = vld [vmem:[#allocation10 + $0x50] sm:$0xff]  }
 0x1ae   : > { %1060 = vmatprep.subr.bf16.mxu0 %v1992_v36  ;;  %1109 = vmatprep.subr.bf16.mxu1 %v1992_v36  ;;  %v2032_v36 = vld [vmem:[#allocation10 + $0xd0] sm:$0xff]  }
 0x1b1   : > { %1061 = vmatpush1.bf16.msra.mxu0 %v1990_v37  ;;  %1110 = vmatpush1.bf16.msra.mxu1 %v1990_v37  ;;  %v2033_v37 = vld [vmem:[#allocation10 + $0x10] sm:$0xff]  }
 0x1b2   : > { %1062 = vmatprep.subr.bf16.mxu0 %v1995_v38  ;;  %1111 = vmatprep.subr.bf16.mxu1 %v1995_v38  ;;  %v2034_v38 = vld [vmem:[#allocation10 + $0x90] sm:$0xff]  }
 0x1b5   : > { %1063 = vmatpush1.bf16.msra.mxu0 %v1993_v39  ;;  %1112 = vmatpush1.bf16.msra.mxu1 %v1993_v39  ;;  %v2035_v39 = vld [vmem:[#allocation10 + $0x58] sm:$0xff]  }
 0x1b6   : > { %1064 = vmatprep.subr.bf16.mxu0 %v1998_v40  ;;  %1113 = vmatprep.subr.bf16.mxu1 %v1998_v40  ;;  %v2036_v40 = vld [vmem:[#allocation10 + $0xd8] sm:$0xff]  }
 0x1b9   : > { %1065 = vmatpush1.bf16.msra.mxu0 %v1996_v41  ;;  %1114 = vmatpush1.bf16.msra.mxu1 %v1996_v41  ;;  %v2037_v41 = vld [vmem:[#allocation10 + $0x18] sm:$0xff]  }
 0x1ba   : > { %1066 = vmatprep.subr.bf16.mxu0 %v2001_v42  ;;  %1115 = vmatprep.subr.bf16.mxu1 %v2001_v42  ;;  %v2038_v42 = vld [vmem:[#allocation10 + $0x98] sm:$0xff]  }
 0x1bd   : > { %1067 = vmatpush1.bf16.msra.mxu0 %v1999_v43  ;;  %1116 = vmatpush1.bf16.msra.mxu1 %v1999_v43  ;;  %v2039_v43 = vld [vmem:[#allocation10 + $0x60] sm:$0xff]  }
 0x1be   : > { %1068 = vmatprep.subr.bf16.mxu0 %v2004_v44  ;;  %1117 = vmatprep.subr.bf16.mxu1 %v2004_v44  ;;  %v2040_v44 = vld [vmem:[#allocation10 + $0xe0] sm:$0xff]  }
 0x1c1   : > { %1069 = vmatpush1.bf16.msra.mxu0 %v2002_v45  ;;  %1118 = vmatpush1.bf16.msra.mxu1 %v2002_v45  ;;  %v2041_v45 = vld [vmem:[#allocation10 + $0x20] sm:$0xff]  }
 0x1c2   : > { %1070 = vmatprep.subr.bf16.mxu0 %v2007_v46  ;;  %1119 = vmatprep.subr.bf16.mxu1 %v2007_v46  ;;  %v2042_v46 = vld [vmem:[#allocation10 + $0xa0] sm:$0xff]  }
 0x1c5   : > { %1071 = vmatpush1.bf16.msra.mxu0 %v2005_v47  ;;  %1120 = vmatpush1.bf16.msra.mxu1 %v2005_v47  ;;  %v2043_v47 = vld [vmem:[#allocation10 + $0x68] sm:$0xff]  }
 0x1c6   : > { %1072 = vmatprep.subr.bf16.mxu0 %v2010_v48  ;;  %1121 = vmatprep.subr.bf16.mxu1 %v2010_v48  ;;  %v2044_v48 = vld [vmem:[#allocation10 + $0xe8] sm:$0xff]  }
 0x1c9   : > { %1073 = vmatpush1.bf16.msra.mxu0 %v2008_v49  ;;  %1122 = vmatpush1.bf16.msra.mxu1 %v2008_v49  ;;  %v2045_v49 = vld [vmem:[#allocation10 + $0x28] sm:$0xff]  }
 0x1ca   : > { %1074 = vmatprep.subr.bf16.mxu0 %v2013_v50  ;;  %1123 = vmatprep.subr.bf16.mxu1 %v2013_v50  ;;  %v2046_v50 = vld [vmem:[#allocation10 + $0xa8] sm:$0xff]  }
 0x1cd   : > { %1075 = vmatpush1.bf16.msra.mxu0 %v2011_v51  ;;  %1124 = vmatpush1.bf16.msra.mxu1 %v2011_v51  ;;  %v2047_v51 = vld [vmem:[#allocation10 + $0x70] sm:$0xff]  }
 0x1ce   : > { %1076 = vmatprep.subr.bf16.mxu0 %v2016_v52  ;;  %1125 = vmatprep.subr.bf16.mxu1 %v2016_v52  ;;  %v2048_v52 = vld [vmem:[#allocation10 + $0xf0] sm:$0xff]  }
 0x1d1   : > { %1077 = vmatpush1.bf16.msra.mxu0 %v2014_v53  ;;  %1126 = vmatpush1.bf16.msra.mxu1 %v2014_v53  ;;  %v2049_v53 = vld [vmem:[#allocation10 + $0x30] sm:$0xff]  }
 0x1d2   : > { %1078 = vmatprep.subr.bf16.mxu0 %v2019_v54  ;;  %1127 = vmatprep.subr.bf16.mxu1 %v2019_v54  ;;  %v2050_v54 = vld [vmem:[#allocation10 + $0xb0] sm:$0xff]  }
 0x1d5   : > { %1079 = vmatpush1.bf16.msra.mxu0 %v2017_v55  ;;  %1128 = vmatpush1.bf16.msra.mxu1 %v2017_v55  ;;  %v2051_v55 = vld [vmem:[#allocation10 + $0x78] sm:$0xff]  }
 0x1d6   : > { %1080 = vmatprep.subr.bf16.mxu0 %v2022_v56  ;;  %1129 = vmatprep.subr.bf16.mxu1 %v2022_v56  ;;  %v2052_v56 = vld [vmem:[#allocation10 + $0xf8] sm:$0xff]  }
 0x1d9   : > { %1081 = vmatpush1.bf16.msra.mxu0 %v2020_v57  ;;  %1130 = vmatpush1.bf16.msra.mxu1 %v2020_v57  ;;  %v2053_v57 = vld [vmem:[#allocation10 + $0x38] sm:$0xff]  }
 0x1da   : > { %1763 = vmatprep.subr.bf16.mxu0 %v2023_v59  ;;  %1785 = vmatprep.subr.bf16.mxu1 %v2024_v61  ;;  %v2054_v59 = vld [vmem:[#allocation10 + $0xb8] sm:$0xff]   ;;  %v1689_v61 = vld [vmem:[%s2647_s5 + $0x2] ss:$4 sm:$0x3] }
 0x1db   : > { %v883_v62 = vrot.slane %v1689_v61, %v2569_v58 }
 0x26f   : > { %v781_v1 = vpop.f32.mrb[4].mxu0  ;;  %v830_v2 = vpop.f32.mrb[4].mxu1 }
 0x270   : > { %v782_v3 = vadd.f32 %v781_v1, %v580_v63  ;;  %v831_v4 = vadd.f32 %v830_v2, %v580_v63  ;;  %v783_v5 = vpop.f32.mrb[5].mxu0  ;;  %v832_v6 = vpop.f32.mrb[5].mxu1 }
 0x271   : > { %v784_v7 = vadd.f32 %v783_v5, %v584_v0  ;;  %v833_v8 = vadd.f32 %v832_v6, %v584_v0  ;;  %v785_v9 = vpop.f32.mrb[6].mxu0  ;;  %v834_v10 = vpop.f32.mrb[6].mxu1 }
 0x272   : > { %v786_v11 = vadd.f32 %v785_v9, %v580_v63  ;;  %v835_v12 = vadd.f32 %v834_v10, %v580_v63  ;;  %v787_v13 = vpop.f32.mrb[7].mxu0  ;;  %v836_v14 = vpop.f32.mrb[7].mxu1  ;;  %v790_v17 = vmax.f32 %v782_v3, 0.0  ;;  %v839_v18 = vmax.f32 %v831_v4, 0.0 }
 0x273   : > { %v788_v15 = vadd.f32 %v787_v13, %v584_v0  ;;  %v837_v16 = vadd.f32 %v836_v14, %v584_v0  ;;  %v791_v21 = vmax.f32 %v784_v7, 0.0  ;;  %v840_v22 = vmax.f32 %v833_v8, 0.0 }
 0x274   : > { %v792_v19 = vmax.f32 %v786_v11, 0.0  ;;  %v841_v20 = vmax.f32 %v835_v12, 0.0  ;;  %v887_v63 = vrot.slane %v1689_v61, %v2574_v60 }
 0x275   : > { %v793_v23 = vmax.f32 %v788_v15, 0.0  ;;  %v842_v24 = vmax.f32 %v837_v16, 0.0 }
 0x276   : > { %v845_v25 = vpack.c.bf16 %v792_v19, %v790_v17  ;;  %v1097_v26 = vpack.c.bf16 %v841_v20, %v839_v18 }
 0x277   : > { %v846_v27 = vpack.c.bf16 %v793_v23, %v791_v21  ;;  %v1098_v28 = vpack.c.bf16 %v842_v24, %v840_v22 }
 0x279   : > { %1082 = vmatprep.mubr.bf16.mxu0 %v846_v27  ;;  %1131 = vmatprep.mubr.bf16.mxu1 %v1098_v28  ;;  %v1722_v28 = vld [vmem:[%s2647_s5 + $0x3] ss:$0 sm:$0xff] }
 0x27a   : > { %1083 = vmatmul.mubr.bf16.vlgmr.msra.gmra.mrb[8].mxu0 %v845_v25  ;;  %1132 = vmatmul.mubr.bf16.vlgmr.msra.gmra.mrb[8].mxu1 %v1097_v26 }
 0x27b   : > { %1764 = vmatpush3.bf16.msra.mxu0 %v2025_v29  ;;  %1786 = vmatpush3.bf16.msra.mxu1 %v2026_v30 }
 0x27c   : > { %1765 = vmatprep.subr.bf16.mxu0 %v2027_v31  ;;  %1787 = vmatprep.subr.bf16.mxu1 %v2028_v32 }
 0x27f   : > { %1766 = vmatpush3.bf16.msra.mxu0 %v2029_v33  ;;  %1788 = vmatpush3.bf16.msra.mxu1 %v2030_v34 }
 0x280   : > { %1767 = vmatprep.subr.bf16.mxu0 %v2031_v35  ;;  %1789 = vmatprep.subr.bf16.mxu1 %v2032_v36 }
 0x283   : > { %1768 = vmatpush3.bf16.msra.mxu0 %v2033_v37  ;;  %1790 = vmatpush3.bf16.msra.mxu1 %v2034_v38 }
 0x284   : > { %1769 = vmatprep.subr.bf16.mxu0 %v2035_v39  ;;  %1791 = vmatprep.subr.bf16.mxu1 %v2036_v40 }
 0x287   : > { %1770 = vmatpush3.bf16.msra.mxu0 %v2037_v41  ;;  %1792 = vmatpush3.bf16.msra.mxu1 %v2038_v42 }
 0x288   : > { %1771 = vmatprep.subr.bf16.mxu0 %v2039_v43  ;;  %1793 = vmatprep.subr.bf16.mxu1 %v2040_v44 }
 0x28b   : > { %1772 = vmatpush3.bf16.msra.mxu0 %v2041_v45  ;;  %1794 = vmatpush3.bf16.msra.mxu1 %v2042_v46 }
 0x28c   : > { %1773 = vmatprep.subr.bf16.mxu0 %v2043_v47  ;;  %1795 = vmatprep.subr.bf16.mxu1 %v2044_v48 }
 0x28f   : > { %1774 = vmatpush3.bf16.msra.mxu0 %v2045_v49  ;;  %1796 = vmatpush3.bf16.msra.mxu1 %v2046_v50 }
 0x290   : > { %1775 = vmatprep.subr.bf16.mxu0 %v2047_v51  ;;  %1797 = vmatprep.subr.bf16.mxu1 %v2048_v52 }
 0x293   : > { %1776 = vmatpush3.bf16.msra.mxu0 %v2049_v53  ;;  %1798 = vmatpush3.bf16.msra.mxu1 %v2050_v54 }
 0x294   : > { %1777 = vmatprep.subr.bf16.mxu0 %v2051_v55  ;;  %1799 = vmatprep.subr.bf16.mxu1 %v2052_v56 }
 0x297   : > { %1778 = vmatpush3.bf16.msra.mxu0 %v2053_v57  ;;  %1800 = vmatpush3.bf16.msra.mxu1 %v2054_v59 }
 0x34d   : > { %v1084_v0 = vpop.f32.mrb[8].mxu0  ;;  %v1133_v1 = vpop.f32.mrb[8].mxu1 }
 0x34e   : > { %v1085_v2 = vadd.f32 %v1084_v0, %v883_v62  ;;  %v1134_v3 = vadd.f32 %v1133_v1, %v883_v62  ;;  %v1086_v4 = vpop.f32.mrb[9].mxu0  ;;  %v1135_v5 = vpop.f32.mrb[9].mxu1 }
 0x34f   : > { %v1087_v6 = vadd.f32 %v1086_v4, %v887_v63  ;;  %v1136_v7 = vadd.f32 %v1135_v5, %v887_v63  ;;  %v1088_v8 = vpop.f32.mrb[10].mxu0  ;;  %v1137_v9 = vpop.f32.mrb[10].mxu1 }
 0x350   : > { %v1089_v10 = vadd.f32 %v1088_v8, %v883_v62  ;;  %v1138_v11 = vadd.f32 %v1137_v9, %v883_v62  ;;  %v1090_v12 = vpop.f32.mrb[11].mxu0  ;;  %v1139_v13 = vpop.f32.mrb[11].mxu1  ;;  %v1093_v16 = vmax.f32 %v1085_v2, 0.0  ;;  %v1142_v58 = vmax.f32 %v1134_v3, 0.0 }
 0x351   : > { %v1091_v14 = vadd.f32 %v1090_v12, %v887_v63  ;;  %v1140_v15 = vadd.f32 %v1139_v13, %v887_v63  ;;  %v1094_v18 = vmax.f32 %v1087_v6, 0.0  ;;  %v1143_v19 = vmax.f32 %v1136_v7, 0.0 }
 0x352   : > { %v1095_v17 = vmax.f32 %v1089_v10, 0.0  ;;  %v1144_v60 = vmax.f32 %v1138_v11, 0.0 }
 0x353   : > { %v1096_v20 = vmax.f32 %v1091_v14, 0.0  ;;  %v1145_v21 = vmax.f32 %v1140_v15, 0.0 }
 0x354   : > { %v1146_v22 = vpack.c.bf16 %v1095_v17, %v1093_v16  ;;  %v1148_v23 = vpack.c.bf16 %v1144_v60, %v1142_v58 }
 0x355   : > { %v1147_v24 = vpack.c.bf16 %v1096_v20, %v1094_v18  ;;  %v1149_v25 = vpack.c.bf16 %v1145_v21, %v1143_v19 }
 0x357   : > { %1443 = vmatprep.mubr.bf16.mxu0 %v1147_v24  ;;  %1484 = vmatprep.mubr.bf16.mxu1 %v1149_v25 }
 0x358   : > { %1444 = vmatmul.mubr.bf16.vlgmr.msra.gmra.mrb[12].mxu0 %v1146_v22  ;;  %1485 = vmatmul.mubr.bf16.vlgmr.msra.gmra.mrb[12].mxu1 %v1148_v23 }
 0x42b   : > { %v1779_v26 = vpop.f32.mrb[12].mxu0  ;;  %v1801_v27 = vpop.f32.mrb[12].mxu1 }
 0x42c   : > { %v1780_v29 = vpop.f32.mrb[13].mxu0  ;;  %v1802_v30 = vpop.f32.mrb[13].mxu1 }
 0x42d   : > { %v1781_v31 = vadd.f32 %v1780_v29, %v1779_v26  ;;  %v1803_v32 = vadd.f32 %v1802_v30, %v1801_v27  ;;  %v1782_v33 = vpop.f32.mrb[14].mxu0  ;;  %v1804_v34 = vpop.f32.mrb[14].mxu1 }
 0x42e   : > { %v1783_v35 = vpop.f32.mrb[15].mxu0  ;;  %v1805_v36 = vpop.f32.mrb[15].mxu1 }
 0x42f   : > { %v1446_v37 = vadd.f32 %v1781_v31, %v1722_v28  ;;  %v1784_v38 = vadd.f32 %v1783_v35, %v1782_v33  ;;  %v1806_v39 = vadd.f32 %v1805_v36, %v1804_v34 }
 0x431   : > { %v1487_v40 = vadd.f32 %v1803_v32, %v1446_v37  ;;  %v1449_v41 = vadd.f32 %v1784_v38, %v1722_v28 }
 0x433   : > { %2055 = vtanh.f32 %v1487_v40  ;;  %v1490_v42 = vadd.f32 %v1806_v39, %v1449_v41 }
 0x435   : > { %2057 = vtanh.f32 %v1490_v42 }
 0x43d   : > { %v2056_v43 = vpop.eup %2055 }
 0x43e   : > { %1495 = vst [vmem:[%s328_s15] sm:$0xff] %v2056_v43 }
 0x43f   : > { %v2058_v44 = vpop.eup %2057 }
 0x440   : > { %1496 = vst [vmem:[%s328_s15 + $0x8] sm:$0xff] %v2058_v44 }
 0x441   : > { %2214 = shalt.err (!%p2211_p13)
}
 0x442   : > { %s2215_s9 = scalar_lea.hbm %s2596_s27, 256  ;;  %s2219_s13 = scalar_lea.hbm %s2648_s6, 512 }
 0x443   : > { %p2216_p9 = scmp.ne.s32.totalorder %s2596_s27, %s2215_s9  ;;  %p2220_p4 = scmp.lt.u32.totalorder %s2596_s27, %s2648_s6 }
 0x444   : > { %p2221_p8 = scmp.lt.u32.totalorder %s2219_s13, %s2215_s9  ;;  %p2223_p10 = scmp.lt.u32.totalorder %s2215_s9, %s2596_s27 }
 0x445   : > { %p2217_p0 = pnand %p2216_p9, %p2498_p3 }
 0x446   : > { %p2222_p6 = por %p2221_p8, %p2220_p4 }
 0x447   : > { %p2218_p11 = pneg %p2217_p0 }
 0x448   : > { %p2224_p5 = por %p2223_p10, %p2222_p6 }
 0x44a   : > { %p2225_p7 = pnand %p2224_p5, %p2218_p11 }
 0x44c   : > { %2228 = shalt.err (!%p2225_p7)
}
 0x44d   : > { %s2290_s20 = smov 128   ;;  %s2291_s8 = smov 8  }
 0x44e   : > { %1825 = dma.vmem_to_hbm [thread:$0]  (%p2498_p3), %s2598_s14, 256, %s2596_s27, %s1498_s29, %s2290_s20, %s2290_s20, %s2291_s8  }
 0x44f PF: > { %s1526_s7 = sand.u32 1, %s2263_s21   ;;  %p2666_p12 = scmp.ne.s32.totalorder %s2653_s28, 0 }
 0x450   : > { %p2667_p1 = scmp.ge.s32.totalorder %s2275_s24, 2  ;;  %s1527_s25 = scalar_lea.sflag [#allocation4], %s1526_s7 }
 0x452   : > { %p1845_p2 = pnand %p2667_p1, %p2666_p12 }
 0x454   : > { %2258 = dma.done.wait (!%p1845_p2), %s1527_s25, 256  }
 0x455   : > { %2260 = vsyncadd (!%p1845_p2), %s1527_s25, 4294967040  ;;  %p21_p13 = scmp.ge.s32.totalorder %s2485_s11, 4   ;;  %s2668_s21 = smov %s2267_s22 }
 0x456   : > { %s2669_s22 = smov %s2271_s23  ;;  %s2670_s23 = smov %s2494_s16 }
 0x457   : > { %s2671_s24 = smov %s2485_s11  ;;  %23 = sbr.rel (!%p21_p13) target bundleno = 7 (0x7), region = 107 }
 0x45e   :  { %1532 = vsyncpa [#allocation3], 1 }
 0x45f   :  { %1534 = vsyncpa [#allocation3 + $0x1], 1 }
 0x460   :  { %1535 = vsyncpa [#allocation6], 1 }
 0x461   :  { %1536 = vsyncpa [#allocation9], 1 }
 0x462   :  { %1537 = vsyncpa [#allocation4], 1 }
 0x463   :  { %1539 = vsyncpa [#allocation4 + $0x1], 1 }

</bundles_post_ra>
